<compile_context>
chip_gen: v5e
topology: v5e:2x2
jax: 0.10.0
libtpu: 0.0.40
codegen_flags: <defaults>
</compile_context>

<pallas_src>
import jax
import jax.numpy as jnp
from jax.experimental import pallas as pl
from jax.experimental.pallas import tpu as pltpu

M, K, N = 120, 256, 256   # fixed by the module's weight (256,256) and bias (120,256)
TN = 128                  # N-tile width (lane-dense, matches MXU width)


def _linear_kernel(x_ref, y_ref, w_ref, b_ref, o_ref):
    # out_tile = x_tile + (y @ W_tile + b_tile), accumulate matmul in f32 on MXU.
    acc = jnp.dot(y_ref[...], w_ref[...], preferred_element_type=jnp.float32)
    o_ref[...] = (x_ref[...].astype(jnp.float32)
                  + acc
                  + b_ref[...].astype(jnp.float32)).astype(o_ref.dtype)


def linear_forward(x, y, weight, bias):
    assert x.shape == (M, N) and y.shape == (M, K)
    assert weight.shape == (K, N) and bias.shape == (M, N)

    cost = pl.CostEstimate(
        flops=2 * M * K * N,                     # ~15.7 MFLOP
        bytes_accessed=4 * (M * N * 3 + M * K + K * N),  # x, bias, out, y, weight
        transcendentals=0,
    )

    return pl.pallas_call(
        _linear_kernel,
        out_shape=jax.ShapeDtypeStruct((M, N), x.dtype),
        grid_spec=pltpu.PrefetchScalarGridSpec(
            num_scalar_prefetch=0,
            grid=(N // TN,),  # 2 independent N-tiles
            in_specs=[
                pl.BlockSpec((M, TN), lambda j: (0, j)),  # x    (120,128) per tile
                pl.BlockSpec((M, K),  lambda j: (0, 0)),  # y    fetched once, resident
                pl.BlockSpec((K, TN), lambda j: (0, j)),  # W    (256,128) per tile
                pl.BlockSpec((M, TN), lambda j: (0, j)),  # bias (120,128) per tile
            ],
            out_specs=pl.BlockSpec((M, TN), lambda j: (0, j)),
        ),
        compiler_params=pltpu.CompilerParams(
            dimension_semantics=("parallel",),  # shard N-tiles across TCs on v7x
        ),
        cost_estimate=cost,
    )(x, y, weight, bias)


if __name__ == "__main__":
    key = jax.random.PRNGKey(0)
    kx, ky = jax.random.split(key)

    # Deterministic parameters, same as the PyTorch module's __init__.
    weight = jnp.ones((K, N), dtype=jnp.float32)
    bias = jnp.ones((M, N), dtype=jnp.float32)

    # Example inputs consistent with the forward's broadcasting requirements.
    x = jax.random.normal(kx, (M, N), dtype=jnp.float32)
    y = jax.random.normal(ky, (M, K), dtype=jnp.float32)

    out = linear_forward(x, y, weight, bias)
    out = jax.block_until_ready(out)

    # Reference check in plain JAX.
    ref = x + (y @ weight + bias)
    assert jnp.allclose(out, ref, atol=1e-4, rtol=1e-4), "mismatch vs reference"

    print("KERNEL_OK")
</pallas_src>

<mosaic_0001>
module attributes {stable_mosaic.version = 11 : i64} {
  func.func @_linear_kernel(%arg0: i32, %arg1: memref<120x128xf32, #tpu.memory_space<vmem>>, %arg2: memref<120x256xf32, #tpu.memory_space<vmem>>, %arg3: memref<256x128xf32, #tpu.memory_space<vmem>>, %arg4: memref<120x128xf32, #tpu.memory_space<vmem>>, %arg5: memref<120x128xf32, #tpu.memory_space<vmem>>) attributes {dimension_semantics = [#tpu.dimension_semantics<parallel>], iteration_bounds = array<i64: 2>, scalar_prefetch = 0 : i64, scratch_operands = 0 : i64, tpu.core_type = #tpu.core_type<tc>, window_params = [{transform_indices = @transform_0, window_bounds = array<i64: 120, 128>}, {pipeline_mode = #tpu.pipeline_mode<synchronous>, transform_indices = @transform_1, window_bounds = array<i64: 120, 256>}, {transform_indices = @transform_2, window_bounds = array<i64: 256, 128>}, {transform_indices = @transform_3, window_bounds = array<i64: 120, 128>}, {transform_indices = @transform_4, window_bounds = array<i64: 120, 128>}]} {
    %c0 = arith.constant 0 : index
    %c0_0 = arith.constant 0 : index
    %0 = vector.load %arg2[%c0, %c0_0] : memref<120x256xf32, #tpu.memory_space<vmem>>, vector<120x256xf32>
    %c0_1 = arith.constant 0 : index
    %c0_2 = arith.constant 0 : index
    %1 = vector.load %arg3[%c0_1, %c0_2] : memref<256x128xf32, #tpu.memory_space<vmem>>, vector<256x128xf32>
    %cst = arith.constant dense<0.000000e+00> : vector<120x128xf32>
    %2 = tpu.matmul %0, %1, %cst {dimension_numbers = #tpu.dot_dimension_numbers<[1], [0], [0], [1], [0, 0, 1, 1], [], []>} : vector<120x256xf32>, vector<256x128xf32>, vector<120x128xf32> -> vector<120x128xf32>
    %c0_3 = arith.constant 0 : index
    %c0_4 = arith.constant 0 : index
    %3 = vector.load %arg1[%c0_3, %c0_4] : memref<120x128xf32, #tpu.memory_space<vmem>>, vector<120x128xf32>
    %4 = arith.addf %3, %2 : vector<120x128xf32>
    %c0_5 = arith.constant 0 : index
    %c0_6 = arith.constant 0 : index
    %5 = vector.load %arg4[%c0_5, %c0_6] : memref<120x128xf32, #tpu.memory_space<vmem>>, vector<120x128xf32>
    %6 = arith.addf %4, %5 : vector<120x128xf32>
    %c0_7 = arith.constant 0 : index
    %c0_8 = arith.constant 0 : index
    %7 = vector.load %arg5[%c0_7, %c0_8] : memref<120x128xf32, #tpu.memory_space<vmem>>, vector<120x128xf32>
    tpu.vector_store %arg5[%c0_7, %c0_8], %6 {strides = array<i32>} : memref<120x128xf32, #tpu.memory_space<vmem>>, vector<120x128xf32>,
    return
  }
  func.func @transform_0(%arg0: i32) -> (i32, i32) {
    %c0_i32 = arith.constant 0 : i32
    %c0_i32_0 = arith.constant 0 : i32
    return %c0_i32, %arg0 : i32, i32
  }
  func.func @transform_1(%arg0: i32) -> (i32, i32) {
    %c0_i32 = arith.constant 0 : i32
    %c0_i32_0 = arith.constant 0 : i32
    %c0_i32_1 = arith.constant 0 : i32
    return %c0_i32, %c0_i32_0 : i32, i32
  }
  func.func @transform_2(%arg0: i32) -> (i32, i32) {
    %c0_i32 = arith.constant 0 : i32
    %c0_i32_0 = arith.constant 0 : i32
    return %c0_i32, %arg0 : i32, i32
  }
  func.func @transform_3(%arg0: i32) -> (i32, i32) {
    %c0_i32 = arith.constant 0 : i32
    %c0_i32_0 = arith.constant 0 : i32
    return %c0_i32, %arg0 : i32, i32
  }
  func.func @transform_4(%arg0: i32) -> (i32, i32) {
    %c0_i32 = arith.constant 0 : i32
    %c0_i32_0 = arith.constant 0 : i32
    return %c0_i32, %arg0 : i32, i32
  }
}

</mosaic_0001>

<bundles_post_ra>
// kernel: tpu_custom_call.1
= control target key start
LH: loop header
LB: loop body
LE: loop exit
PB: predicated region body
PF: predicated region fallthrough
CT: control target
= control target key end

     0   :  { %s1359_s0 = inlined_call_operand.hbm [shape: f32[120,256], index: 0, kind: input, shape index: {}]   ;;  %s1360_s1 = inlined_call_operand.hbm [shape: f32[120,256], index: 1, kind: input, shape index: {}]   ;;  %s1361_s2 = inlined_call_operand.hbm [shape: f32[256,256], index: 2, kind: input, shape index: {}]   ;;  %s1362_s3 = inlined_call_operand.hbm [shape: f32[120,256], index: 3, kind: input, shape index: {}]   ;;  %s1363_s4 = inlined_call_operand.hbm [shape: f32[120,256], index: 4, kind: output, shape index: {}]  }
   0x1   :  { %1367 = sst [smem:[#allocation14_spill]] %s1359_s0 }
   0x2   :  { %9 = vsyncpa [#allocation3], 0 }
   0x3   :  { %11 = vsyncpa [#allocation3 + $0x1], 0 }
   0x4   :  { %12 = vsyncpa [#allocation6], 0 }
   0x5   :  { %13 = vsyncpa [#allocation4], 0 }
   0x6   :  { %15 = vsyncpa [#allocation4 + $0x1], 0  ;;  %s1061_s15 = smov 0   ;;  %s1063_s16 = smov 0  }
   0x7   :  { %s1065_s17 = smov 0   ;;  %s1067_s18 = smov 0  }
   0x8 LB: > { %s1082_s19 = sadd.s32 1, %s1026_s18   ;;  %s28_s20 = sadd.s32 1, %s1022_s17  ;;  %s1026_s18 = sphi %s1067_s18, %s1382_s18   ;;  %s1022_s17 = sphi %s1065_s17, %s1381_s17   ;;  %s1018_s16 = sphi %s1063_s16, %s1380_s16   ;;  %s1014_s15 = sphi %s1061_s15, %s1379_s15  }
   0x9   : > { %s25_s21 = ssub.s32 %s1026_s18, %s1082_s19  ;;  %p35_p0 = scmp.ne.s32.totalorder %s1022_s17, %s1018_s16 }
   0xa   : > { %p26_p1 = scmp.eq.s32.totalorder %s25_s21, 0  ;;  %p36_p2 = scmp.eq.s32.totalorder %s1026_s18, 0 }
   0xb   : > { %p789_p5 = scmp.lt.s32.totalorder %s1026_s18, 2  ;;  %s178_s23 = sand.u32 1, %s1026_s18  }
   0xc   : > { %s1092_s22 = scalar_select %p26_p1, %s1022_s17, %s28_s20  }
   0xd   : > { %p37_p4 = por %p36_p2, %p35_p0  ;;  %s180_s24 = sand.u32 1, %s1022_s17  }
   0xe   : > { %s1100_s25 = smul.u32 120, %s180_s24  ;;  %s1103_s26 = sshll.u32 %s1026_s18, 3 }
   0xf   : > { %p1105_p6 = pnand %p789_p5, %p37_p4  ;;  %s1369_s0 = sld [smem:[#allocation14_spill]] }
  0x10   : > { %s182_s6 = scalar_lea.vmem [#allocation2], %s1100_s25  ;;  %s714_s8 = sshll.u32 %s180_s24, 8 }
  0x11   : > { %s189_s7 = sshll.u32 %s182_s6, 4  ;;  %s1114_s9 = scalar_lea.sflag [#allocation3], %s178_s23  ;;  %s190_s7 = int_to_ptr.vmem [resolvable:$true] %s189_s7 }
  0x12   : > { %p836_p8 = pneg %p1105_p6 }
  0x15   : > { %s186_s30 = scalar_lea.hbm %s1369_s0, %s1103_s26  ;;  %s839_s14 = scalar_lea.hbm %s1369_s0, 240 }
  0x16   : > { %s187_s5 = sshll.u32 %s186_s30, 4  ;;  %s188_s5 = int_to_ptr.hbm [resolvable:$true] %s187_s5 }
  0x17   : > { %s832_s10 = sshra.s32 %s188_s5, 4  ;;  %s833_s10 = int_to_ptr.hbm [resolvable:$true] %s832_s10 }
  0x18   : > { %s834_s11 = scalar_lea.hbm %s833_s10, 120  ;;  %p840_p11 = scmp.lt.s32.totalorder %s833_s10, %s1369_s0 }
  0x19   : > { %p835_p7 = scmp.ne.s32.totalorder %s833_s10, %s834_s11  ;;  %p841_p12 = scmp.lt.s32.totalorder %s839_s14, %s834_s11 }
  0x1b   : > { %p837_p9 = pnand %p836_p8, %p835_p7  ;;  %p842_p13 = por %p841_p12, %p840_p11 }
  0x1d   : > { %p838_p10 = pneg %p837_p9 }
  0x1f   : > { %p843_p1 = pnand %p842_p13, %p838_p10 }
  0x21   : > { %846 = shalt.err (!%p843_p1)
}
  0x22   : > { %s1028_s23 = smov 256   ;;  %s1364_s24 = smov 128  }
  0x23   : > { %s1365_s28 = smov 8   ;;  %s207_s6 = scalar_lea.hbm %s1361_s2, %s1103_s26 }
  0x24   : > { %777 = dma.hbm_to_vmem [thread:$0]  (!%p1105_p6), %s188_s5, 1920, %s190_s7, %s1114_s9, %s1028_s23, %s1364_s24, %s1365_s28  }
  0x25   : > { %s208_s10 = sshll.u32 %s207_s6, 4  ;;  %s203_s11 = scalar_lea.vmem [#allocation7], %s714_s8  ;;  %s209_s10 = int_to_ptr.hbm [resolvable:$true] %s208_s10 }
  0x26   : > { %s210_s12 = sshll.u32 %s203_s11, 4  ;;  %s862_s13 = sshra.s32 %s209_s10, 4  ;;  %s211_s12 = int_to_ptr.vmem [resolvable:$true] %s210_s12  ;;  %s863_s13 = int_to_ptr.hbm [resolvable:$true] %s862_s13 }
  0x27   : > { %s864_s14 = scalar_lea.hbm %s863_s13, 256  ;;  %s869_s5 = scalar_lea.hbm %s1361_s2, 512 }
  0x28   : > { %p865_p2 = scmp.ne.s32.totalorder %s863_s13, %s864_s14  ;;  %p870_p7 = scmp.lt.s32.totalorder %s863_s13, %s1361_s2 }
  0x29   : > { %p871_p9 = scmp.lt.s32.totalorder %s869_s5, %s864_s14 }
  0x2a   : > { %p867_p4 = pnand %p865_p2, %p836_p8 }
  0x2b   : > { %p872_p10 = por %p871_p9, %p870_p7 }
  0x2c   : > { %p868_p5 = pneg %p867_p4 }
  0x2e   : > { %p873_p11 = pnand %p872_p10, %p868_p5 }
  0x30   : > { %876 = shalt.err (!%p873_p11)
}
  0x31   : > { %780 = dma.hbm_to_vmem [thread:$0]  (!%p1105_p6), %s209_s10, 4096, %s211_s12, %s1114_s9, %s1028_s23, %s1364_s24, %s1365_s28  }
  0x32   : > { %s1153_s8 = sadd.s32 4294967295, %s1026_s18   ;;  %s709_s30 = sadd.s32 4294967294, %s1026_s18  }
  0x33   : > { %p41_p12 = scmp.ne.s32.totalorder %s1018_s16, %s1014_s15  ;;  %p1366_p13 = scmp.eq.s32.totalorder %s1153_s8, 0 }
  0x34   : > { %p138_p1 = scmp.eq.s32.totalorder %s1153_s8, 1  ;;  %p144_p2 = scmp.eq.s32.totalorder %s709_s30, 1 }
  0x35   : > { %p1162_p4 = por %p1366_p13, %p41_p12  ;;  %p710_p5 = scmp.ge.s32.totalorder %s1026_s18, 1 }
  0x36   : > { %p1170_p7 = por %p138_p1, %p35_p0  ;;  %p1174_p9 = por %p144_p2, %p41_p12 }
  0x37   : > { %p151_p10 = scmp.lt.s32.totalorder %s1026_s18, 3  ;;  %s162_s14 = sshll.u32 %s1360_s1, 4  ;;  %s163_s14 = int_to_ptr.hbm [resolvable:$true] %s162_s14 }
  0x38   : > { %s1031_s21 = smov [#allocation5]   ;;  %s228_s30 = scalar_lea.hbm %s1362_s3, %s1103_s26 }
  0x39   : > { %p1182_p11 = pnand %p710_p5, %p151_p10  ;;  %s164_s5 = sshll.u32 %s1031_s21, 4  ;;  %s165_s5 = int_to_ptr.vmem [resolvable:$true] %s164_s5 }
  0x3a   : > { %s229_s12 = sshll.u32 %s228_s30, 4  ;;  %s224_s13 = scalar_lea.vmem [#allocation8], %s1100_s25  ;;  %s230_s12 = int_to_ptr.hbm [resolvable:$true] %s229_s12 }
  0x3b   : > { %p770_p0 = pneg %p1182_p11  ;;  %s231_s24 = sshll.u32 %s224_s13, 4  ;;  %s232_s24 = int_to_ptr.vmem [resolvable:$true] %s231_s24 }
  0x3c   : > { %s1032_s28 = smov 16   ;;  %s922_s21 = sshra.s32 %s230_s12, 4  ;;  %s923_s21 = int_to_ptr.hbm [resolvable:$true] %s922_s21 }
  0x3d   : > { %p771_p12 = pnand %p770_p0, %p1366_p13  ;;  %s924_s0 = scalar_lea.hbm %s923_s21, 120 }
  0x3e   : > { %p925_p1 = scmp.ne.s32.totalorder %s923_s21, %s924_s0  ;;  %s929_s29 = scalar_lea.hbm %s1362_s3, 240 }
  0x3f   : > { %773 = dma.hbm_to_vmem [thread:$0]  (!%p771_p12), %s163_s14, 3840, %s165_s5, [#allocation6], %s1028_s23, %s1028_s23, %s1032_s28  }
  0x40   : > { %p927_p2 = pnand %p925_p1, %p836_p8  ;;  %p930_p10 = scmp.lt.s32.totalorder %s923_s21, %s1362_s3 }
  0x41   : > { %p931_p0 = scmp.lt.s32.totalorder %s929_s29, %s924_s0 }
  0x42   : > { %p928_p5 = pneg %p927_p2 }
  0x43   : > { %p932_p3 = por %p931_p0, %p930_p10 }
  0x45   : > { %p933_p13 = pnand %p932_p3, %p928_p5 }
  0x47   : > { %936 = shalt.err (!%p933_p13)
}
  0x48   : > { %s1374_s28 = smov 8   ;;  %s1375_s14 = smov 128  }
  0x49   : > { %783 = dma.hbm_to_vmem [thread:$0]  (!%p1105_p6), %s230_s12, 1920, %s232_s24, %s1114_s9, %s1028_s23, %s1375_s14, %s1374_s28  }
  0x4a   : > { %243 = sbr.rel (%p1182_p11) target bundleno = 317 (0x13d), region = 36  ;;  %s245_s5 = sand.u32 (!%p1182_p11), 1, %s1153_s8  }
  0x4b   : > { %s1216_s13 = sand.u32 (!%p1182_p11), 1, %s1018_s16   ;;  %s246_s21 = scalar_lea.sflag (!%p1182_p11), [#allocation3], %s245_s5 }
  0x4c   : > { %s1219_s0 = smul.u32 (!%p1182_p11), 120, %s1216_s13 }
  0x4e   : > { %s1222_s27 = scalar_lea.vmem (!%p1182_p11), [#allocation2], %s1219_s0 }
  0x4f   : > { %997 = dma.done.wait (%p1162_p4), %s246_s21, 1920  }
  0x50   : > { %999 = vsyncadd (%p1162_p4), %s246_s21, 4294965376  ;;  %p1376_p3 = scmp.eq.s32.totalorder %s1153_s8, 0 }
  0x52   : > { %1001 = dma.done.wait (%p1376_p3), [#allocation6], 3840   ;;  %p1377_p6 = pmov %p1376_p3 }
  0x53   : > { %s719_s9 = sshll.u32 %s1216_s13, 8 }
  0x54   : > { %1003 = vsyncadd (%p1377_p6), [#allocation6], 4294963456  ;;  %s1233_s23 = scalar_lea.vmem [#allocation7], %s719_s9 }
  0x55   : > { %1005 = dma.done.wait (%p1162_p4), %s246_s21, 6016  }
  0x56   : > { %1007 = vsyncadd (%p1162_p4), %s246_s21, 4294961280  ;;  %v355_v0 = vld [vmem:[%s1233_s23 + $0x78] sm:$0xff]  ;;  %v354_v2 = vld [vmem:[%s1233_s23 + $0x70] sm:$0xff]  ;;  %s1273_s24 = scalar_lea.vmem [#allocation8], %s1219_s0  ;;  %s1279_s6 = scalar_lea.vmem [#allocation9], %s1219_s0 }
  0x57   : > { %v371_v1 = vld [vmem:[%s1233_s23 + $0xf8] sm:$0xff]  ;;  %723 = vmatpush.msra.mxu2 %v355_v0  ;;  %v370_v3 = vld [vmem:[%s1233_s23 + $0xf0] sm:$0xff]  ;;  %v353_v4 = vld [vmem:[%s1233_s23 + $0x68] sm:$0xff]  ;;  %372 = vmatpush.msra.mxu0 %v355_v0  ;;  %s720_s20 = sshll.u32 %s1153_s8, 3  ;;  %s583_s29 = sshll.u32 %s1279_s6, 4  ;;  %s584_s29 = int_to_ptr.vmem [resolvable:$true] %s583_s29 }
  0x58   : > { %434 = vmatpush.msra.mxu1 %v371_v1  ;;  %v369_v5 = vld [vmem:[%s1233_s23 + $0xe8] sm:$0xff]  ;;  %739 = vmatpush.msra.mxu3 %v371_v1  ;;  %v352_v6 = vld [vmem:[%s1233_s23 + $0x60] sm:$0xff]  ;;  %v351_v8 = vld [vmem:[%s1233_s23 + $0x58] sm:$0xff]  ;;  %s582_s7 = scalar_lea.hbm %s1363_s4, %s720_s20  ;;  %s572_s8 = scalar_lea.sflag [#allocation4], %s1216_s13 }
  0x59   : > { %724 = vmatpush.msra.mxu2 %v354_v2  ;;  %v368_v7 = vld [vmem:[%s1233_s23 + $0xe0] sm:$0xff]  ;;  %373 = vmatpush.msra.mxu0 %v354_v2  ;;  %v367_v9 = vld [vmem:[%s1233_s23 + $0xd8] sm:$0xff]  ;;  %v350_v10 = vld [vmem:[%s1233_s23 + $0x50] sm:$0xff]  ;;  %s585_s30 = sshll.u32 %s582_s7, 4  ;;  %s972_s0 = scalar_lea.hbm %s1363_s4, 240  ;;  %s586_s30 = int_to_ptr.hbm [resolvable:$true] %s585_s30 }
  0x5a   : > { %435 = vmatpush.msra.mxu1 %v370_v3  ;;  %740 = vmatpush.msra.mxu3 %v370_v3  ;;  %v366_v11 = vld [vmem:[%s1233_s23 + $0xd0] sm:$0xff]  ;;  %v349_v12 = vld [vmem:[%s1233_s23 + $0x48] sm:$0xff]  ;;  %v348_v14 = vld [vmem:[%s1233_s23 + $0x40] sm:$0xff]  ;;  %s966_s25 = sshra.s32 %s586_s30, 4  ;;  %s967_s25 = int_to_ptr.hbm [resolvable:$true] %s966_s25 }
  0x5b   : > { %725 = vmatpush.msra.mxu2 %v353_v4  ;;  %374 = vmatpush.msra.mxu0 %v353_v4  ;;  %v365_v13 = vld [vmem:[%s1233_s23 + $0xc8] sm:$0xff]  ;;  %v364_v15 = vld [vmem:[%s1233_s23 + $0xc0] sm:$0xff]  ;;  %v347_v16 = vld [vmem:[%s1233_s23 + $0x38] sm:$0xff]  ;;  %s968_s28 = scalar_lea.hbm %s967_s25, 120  ;;  %p973_p11 = scmp.lt.s32.totalorder %s967_s25, %s1363_s4 }
  0x5c   : > { %436 = vmatpush.msra.mxu1 %v369_v5  ;;  %741 = vmatpush.msra.mxu3 %v369_v5  ;;  %v363_v17 = vld [vmem:[%s1233_s23 + $0xb8] sm:$0xff]  ;;  %v346_v18 = vld [vmem:[%s1233_s23 + $0x30] sm:$0xff]  ;;  %v345_v20 = vld [vmem:[%s1233_s23 + $0x28] sm:$0xff]  ;;  %p969_p8 = scmp.ne.s32.totalorder %s967_s25, %s968_s28  ;;  %p974_p12 = scmp.lt.s32.totalorder %s972_s0, %s968_s28 }
  0x5d   : > { %726 = vmatpush.msra.mxu2 %v352_v6  ;;  %375 = vmatpush.msra.mxu0 %v352_v6  ;;  %v362_v19 = vld [vmem:[%s1233_s23 + $0xb0] sm:$0xff]  ;;  %v361_v21 = vld [vmem:[%s1233_s23 + $0xa8] sm:$0xff]  ;;  %v344_v22 = vld [vmem:[%s1233_s23 + $0x20] sm:$0xff] }
  0x5e   : > { %437 = vmatpush.msra.mxu1 %v368_v7  ;;  %742 = vmatpush.msra.mxu3 %v368_v7  ;;  %v360_v23 = vld [vmem:[%s1233_s23 + $0xa0] sm:$0xff]  ;;  %v343_v24 = vld [vmem:[%s1233_s23 + $0x18] sm:$0xff]  ;;  %v342_v26 = vld [vmem:[%s1233_s23 + $0x10] sm:$0xff]  ;;  %p970_p13 = pnand %p969_p8, %p1170_p7  ;;  %p975_p1 = por %p974_p12, %p973_p11 }
  0x5f   : > { %727 = vmatpush.msra.mxu2 %v351_v8  ;;  %376 = vmatpush.msra.mxu0 %v351_v8  ;;  %v359_v25 = vld [vmem:[%s1233_s23 + $0x98] sm:$0xff]  ;;  %v358_v27 = vld [vmem:[%s1233_s23 + $0x90] sm:$0xff]  ;;  %v341_v28 = vld [vmem:[%s1233_s23 + $0x8] sm:$0xff] }
  0x60   : > { %438 = vmatpush.msra.mxu1 %v367_v9  ;;  %743 = vmatpush.msra.mxu3 %v367_v9  ;;  %v357_v29 = vld [vmem:[%s1233_s23 + $0x88] sm:$0xff]  ;;  %v340_v30 = vld [vmem:[%s1233_s23] sm:$0xff]  ;;  %v311_v33 = vld [vmem:[#allocation5 + $0x8] sm:$0xff]  ;;  %p971_p4 = pneg %p970_p13 }
  0x61   : > { %728 = vmatpush.msra.mxu2 %v350_v10  ;;  %377 = vmatpush.msra.mxu0 %v350_v10  ;;  %v356_v31 = vld [vmem:[%s1233_s23 + $0x80] sm:$0xff]  ;;  %v310_v34 = vld [vmem:[#allocation5] sm:$0xff]  ;;  %v327_v35 = vld [vmem:[#allocation5 + $0x88] sm:$0xff] }
  0x62   : > { %439 = vmatpush.msra.mxu1 %v366_v11  ;;  %744 = vmatpush.msra.mxu3 %v366_v11  ;;  %v324_v32 = vld [vmem:[#allocation5 + $0x70] sm:$0xff]  ;;  %v326_v36 = vld [vmem:[#allocation5 + $0x80] sm:$0xff]  ;;  %v313_v37 = vld [vmem:[#allocation5 + $0x18] sm:$0xff]  ;;  %p976_p2 = pnand %p975_p1, %p971_p4 }
  0x63   : > { %729 = vmatpush.msra.mxu2 %v349_v12  ;;  %378 = vmatpush.msra.mxu0 %v349_v12  ;;  %v312_v38 = vld [vmem:[#allocation5 + $0x10] sm:$0xff]  ;;  %v329_v39 = vld [vmem:[#allocation5 + $0x98] sm:$0xff]  ;;  %v315_v41 = vld [vmem:[#allocation5 + $0x28] sm:$0xff] }
  0x64   : > { %440 = vmatpush.msra.mxu1 %v365_v13  ;;  %745 = vmatpush.msra.mxu3 %v365_v13  ;;  %v328_v40 = vld [vmem:[#allocation5 + $0x90] sm:$0xff]  ;;  %v314_v42 = vld [vmem:[#allocation5 + $0x20] sm:$0xff]  ;;  %v331_v43 = vld [vmem:[#allocation5 + $0xa8] sm:$0xff] }
  0x65   : > { %730 = vmatpush.msra.mxu2 %v348_v14  ;;  %379 = vmatpush.msra.mxu0 %v348_v14  ;;  %v330_v44 = vld [vmem:[#allocation5 + $0xa0] sm:$0xff]  ;;  %v317_v45 = vld [vmem:[#allocation5 + $0x38] sm:$0xff]  ;;  %v316_v46 = vld [vmem:[#allocation5 + $0x30] sm:$0xff] }
  0x66   : > { %441 = vmatpush.msra.mxu1 %v364_v15  ;;  %746 = vmatpush.msra.mxu3 %v364_v15  ;;  %v333_v47 = vld [vmem:[#allocation5 + $0xb8] sm:$0xff]  ;;  %v332_v48 = vld [vmem:[#allocation5 + $0xb0] sm:$0xff]  ;;  %v319_v49 = vld [vmem:[#allocation5 + $0x48] sm:$0xff] }
  0x67   : > { %731 = vmatpush.msra.mxu2 %v347_v16  ;;  %380 = vmatpush.msra.mxu0 %v347_v16  ;;  %v318_v50 = vld [vmem:[#allocation5 + $0x40] sm:$0xff]  ;;  %v335_v51 = vld [vmem:[#allocation5 + $0xc8] sm:$0xff]  ;;  %v321_v53 = vld [vmem:[#allocation5 + $0x58] sm:$0xff] }
  0x68   : > { %442 = vmatpush.msra.mxu1 %v363_v17  ;;  %747 = vmatpush.msra.mxu3 %v363_v17  ;;  %v334_v52 = vld [vmem:[#allocation5 + $0xc0] sm:$0xff]  ;;  %v320_v54 = vld [vmem:[#allocation5 + $0x50] sm:$0xff]  ;;  %v337_v55 = vld [vmem:[#allocation5 + $0xd8] sm:$0xff] }
  0x69   : > { %732 = vmatpush.msra.mxu2 %v346_v18  ;;  %381 = vmatpush.msra.mxu0 %v346_v18  ;;  %v336_v56 = vld [vmem:[#allocation5 + $0xd0] sm:$0xff]  ;;  %v323_v57 = vld [vmem:[#allocation5 + $0x68] sm:$0xff]  ;;  %v322_v58 = vld [vmem:[#allocation5 + $0x60] sm:$0xff] }
  0x6a   : > { %443 = vmatpush.msra.mxu1 %v362_v19  ;;  %748 = vmatpush.msra.mxu3 %v362_v19  ;;  %v339_v59 = vld [vmem:[#allocation5 + $0xe8] sm:$0xff]  ;;  %v338_v60 = vld [vmem:[#allocation5 + $0xe0] sm:$0xff]  ;;  %v325_v61 = vld [vmem:[#allocation5 + $0x78] sm:$0xff] }
  0x6b   : > { %733 = vmatpush.msra.mxu2 %v345_v20  ;;  %382 = vmatpush.msra.mxu0 %v345_v20  ;;  %v496_v0 = vld [vmem:[%s1222_s27] sm:$0xff]  ;;  %v497_v9 = vld [vmem:[%s1222_s27 + $0x8] sm:$0xff] }
  0x6c   : > { %444 = vmatpush.msra.mxu1 %v361_v21  ;;  %749 = vmatpush.msra.mxu3 %v361_v21  ;;  %v526_v2 = vld [vmem:[%s1273_s24] sm:$0xff]  ;;  %v527_v11 = vld [vmem:[%s1273_s24 + $0x8] sm:$0xff] }
  0x6d   : > { %734 = vmatpush.msra.mxu2 %v344_v22  ;;  %383 = vmatpush.msra.mxu0 %v344_v22  ;;  %v504_v14 = vld [vmem:[%s1222_s27 + $0x40] sm:$0xff]  ;;  %v498_v22 = vld [vmem:[%s1222_s27 + $0x10] sm:$0xff] }
  0x6e   : > { %445 = vmatpush.msra.mxu1 %v360_v23  ;;  %750 = vmatpush.msra.mxu3 %v360_v23  ;;  %v534_v17 = vld [vmem:[%s1273_s24 + $0x40] sm:$0xff] }
  0x6f   : > { %735 = vmatpush.msra.mxu2 %v343_v24  ;;  %384 = vmatpush.msra.mxu0 %v343_v24 }
  0x70   : > { %446 = vmatpush.msra.mxu1 %v359_v25  ;;  %751 = vmatpush.msra.mxu3 %v359_v25  ;;  %v528_v25 = vld [vmem:[%s1273_s24 + $0x10] sm:$0xff] }
  0x71   : > { %736 = vmatpush.msra.mxu2 %v342_v26  ;;  %385 = vmatpush.msra.mxu0 %v342_v26 }
  0x72   : > { %447 = vmatpush.msra.mxu1 %v358_v27  ;;  %752 = vmatpush.msra.mxu3 %v358_v27 }
  0x73   : > { %737 = vmatpush.msra.mxu2 %v341_v28  ;;  %386 = vmatpush.msra.mxu0 %v341_v28  ;;  %v505_v28 = vld [vmem:[%s1222_s27 + $0x48] sm:$0xff] }
  0x74   : > { %448 = vmatpush.msra.mxu1 %v357_v29  ;;  %753 = vmatpush.msra.mxu3 %v357_v29 }
  0x75   : > { %738 = vmatpush.msra.mxu2 %v340_v30  ;;  %387 = vmatpush.msra.mxu0 %v340_v30 }
  0x76   : > { %449 = vmatpush.msra.mxu1 %v356_v31  ;;  %409 = vmatmul.f32.vlgmr.msra.gmra.mxu2 %v324_v32 }
  0x77   : > { %450 = vmatmul.f32.vlgmr.msra.gmra.mxu1 %v311_v33  ;;  %754 = vmatpush.msra.mxu3 %v356_v31  ;;  %v535_v31 = vld [vmem:[%s1273_s24 + $0x48] sm:$0xff] }
  0x78   : > { %388 = vmatmul.f32.vlgmr.msra.gmra.mxu0 %v310_v34  ;;  %474 = vmatmul.f32.vlgmr.msra.gmra.mxu3 %v327_v35 }
  0x7e   : > { %412 = vmatmul.f32.gmra.mxu2 %v326_v36  ;;  %v499_v36 = vld [vmem:[%s1222_s27 + $0x18] sm:$0xff] }
  0x7f   : > { %453 = vmatmul.f32.gmra.mxu1 %v313_v37 }
  0x80   : > { %391 = vmatmul.f32.gmra.mxu0 %v312_v38  ;;  %477 = vmatmul.f32.gmra.mxu3 %v329_v39  ;;  %v529_v39 = vld [vmem:[%s1273_s24 + $0x18] sm:$0xff] }
  0x86   : > { %415 = vmatmul.f32.gmra.mxu2 %v328_v40 }
  0x87   : > { %456 = vmatmul.f32.gmra.mxu1 %v315_v41 }
  0x88   : > { %394 = vmatmul.f32.gmra.mxu0 %v314_v42  ;;  %480 = vmatmul.f32.gmra.mxu3 %v331_v43  ;;  %v506_v42 = vld [vmem:[%s1222_s27 + $0x50] sm:$0xff] }
  0x8e   : > { %418 = vmatmul.f32.gmra.mxu2 %v330_v44 }
  0x8f   : > { %459 = vmatmul.f32.gmra.mxu1 %v317_v45  ;;  %v536_v45 = vld [vmem:[%s1273_s24 + $0x50] sm:$0xff] }
  0x90   : > { %397 = vmatmul.f32.gmra.mxu0 %v316_v46  ;;  %483 = vmatmul.f32.gmra.mxu3 %v333_v47 }
  0x96   : > { %421 = vmatmul.f32.gmra.mxu2 %v332_v48 }
  0x97   : > { %462 = vmatmul.f32.gmra.mxu1 %v319_v49 }
  0x98   : > { %400 = vmatmul.f32.gmra.mxu0 %v318_v50  ;;  %486 = vmatmul.f32.gmra.mxu3 %v335_v51  ;;  %v500_v50 = vld [vmem:[%s1222_s27 + $0x20] sm:$0xff] }
  0x9e   : > { %424 = vmatmul.f32.gmra.mxu2 %v334_v52 }
  0x9f   : > { %465 = vmatmul.f32.gmra.mxu1 %v321_v53  ;;  %v530_v53 = vld [vmem:[%s1273_s24 + $0x20] sm:$0xff] }
  0xa0   : > { %403 = vmatmul.f32.gmra.mxu0 %v320_v54  ;;  %489 = vmatmul.f32.gmra.mxu3 %v337_v55 }
  0xa6   : > { %427 = vmatmul.f32.gmra.mxu2 %v336_v56  ;;  %v507_v56 = vld [vmem:[%s1222_s27 + $0x58] sm:$0xff] }
  0xa7   : > { %468 = vmatmul.f32.gmra.mxu1 %v323_v57 }
  0xa8   : > { %406 = vmatmul.f32.gmra.mxu0 %v322_v58  ;;  %492 = vmatmul.f32.gmra.mxu3 %v339_v59  ;;  %v537_v59 = vld [vmem:[%s1273_s24 + $0x58] sm:$0xff] }
  0xae   : > { %430 = vmatmul.f32.gmra.mxu2 %v338_v60 }
  0xaf   : > { %471 = vmatmul.f32.gmra.mxu1 %v325_v61 }
  0xf4   : > { %v451_v62 = vpop.f32.mrf.mxu1 }
  0xf5   : > { %v389_v63 = vpop.f32.mrf.mxu0 }
  0xf6   : > { %v452_v1 = vadd.f32 %v451_v62, %v389_v63 }
  0xf8   : > { %v511_v3 = vadd.f32 %v496_v0, %v452_v1  ;;  %v501_v0 = vld [vmem:[%s1222_s27 + $0x28] sm:$0xff] }
  0xf9   : > { %v1276_v4 = vpop.f32.mrf.mxu2 }
  0xfa   : > { %v541_v5 = vadd.f32 %v526_v2, %v511_v3  ;;  %v531_v3 = vld [vmem:[%s1273_s24 + $0x28] sm:$0xff] }
  0xfb   : > { %v475_v7 = vpop.f32.mrf.mxu3 }
  0xfc   : > { %v454_v6 = vpop.f32.mrf.mxu1  ;;  %556 = vst [vmem:[%s1279_s6] sm:$0xff] %v541_v5 }
  0xfd   : > { %v392_v8 = vpop.f32.mrf.mxu0 }
  0xfe   : > { %v455_v10 = vadd.f32 %v454_v6, %v392_v8 }
 0x100   : > { %v512_v12 = vadd.f32 %v497_v9, %v455_v10  ;;  %v538_v10 = vld [vmem:[%s1273_s24 + $0x60] sm:$0xff] }
 0x101   : > { %v413_v13 = vpop.f32.mrf.mxu2 }
 0x102   : > { %v542_v15 = vadd.f32 %v527_v11, %v512_v12  ;;  %v476_v16 = vadd.f32 %v475_v7, %v413_v13  ;;  %v508_v7 = vld [vmem:[%s1222_s27 + $0x60] sm:$0xff] }
 0x103   : > { %v478_v19 = vpop.f32.mrf.mxu3 }
 0x104   : > { %v457_v18 = vpop.f32.mrf.mxu1  ;;  %557 = vst [vmem:[%s1279_s6 + $0x8] sm:$0xff] %v542_v15  ;;  %v519_v20 = vadd.f32 %v504_v14, %v476_v16  ;;  %v502_v14 = vld [vmem:[%s1222_s27 + $0x30] sm:$0xff] }
 0x105   : > { %v395_v21 = vpop.f32.mrf.mxu0 }
 0x106   : > { %v549_v23 = vadd.f32 %v534_v17, %v519_v20  ;;  %v458_v24 = vadd.f32 %v457_v18, %v395_v21  ;;  %v532_v18 = vld [vmem:[%s1273_s24 + $0x30] sm:$0xff]  ;;  %v509_v21 = vld [vmem:[%s1222_s27 + $0x68] sm:$0xff] }
 0x108   : > { %564 = vst [vmem:[%s1279_s6 + $0x40] sm:$0xff] %v549_v23  ;;  %v513_v26 = vadd.f32 %v498_v22, %v458_v24  ;;  %v539_v24 = vld [vmem:[%s1273_s24 + $0x68] sm:$0xff] }
 0x109   : > { %v416_v27 = vpop.f32.mrf.mxu2 }
 0x10a   : > { %v543_v29 = vadd.f32 %v528_v25, %v513_v26  ;;  %v479_v30 = vadd.f32 %v478_v19, %v416_v27  ;;  %v503_v26 = vld [vmem:[%s1222_s27 + $0x38] sm:$0xff] }
 0x10b   : > { %v481_v33 = vpop.f32.mrf.mxu3 }
 0x10c   : > { %v460_v32 = vpop.f32.mrf.mxu1  ;;  %558 = vst [vmem:[%s1279_s6 + $0x10] sm:$0xff] %v543_v29  ;;  %v520_v34 = vadd.f32 %v505_v28, %v479_v30  ;;  %v533_v29 = vld [vmem:[%s1273_s24 + $0x38] sm:$0xff] }
 0x10d   : > { %v398_v35 = vpop.f32.mrf.mxu0 }
 0x10e   : > { %v550_v37 = vadd.f32 %v535_v31, %v520_v34  ;;  %v461_v38 = vadd.f32 %v460_v32, %v398_v35  ;;  %v510_v35 = vld [vmem:[%s1222_s27 + $0x70] sm:$0xff] }
 0x110   : > { %565 = vst [vmem:[%s1279_s6 + $0x48] sm:$0xff] %v550_v37  ;;  %v514_v40 = vadd.f32 %v499_v36, %v461_v38 }
 0x111   : > { %v419_v41 = vpop.f32.mrf.mxu2 }
 0x112   : > { %v544_v43 = vadd.f32 %v529_v39, %v514_v40  ;;  %v482_v44 = vadd.f32 %v481_v33, %v419_v41 }
 0x113   : > { %v484_v47 = vpop.f32.mrf.mxu3 }
 0x114   : > { %v463_v46 = vpop.f32.mrf.mxu1  ;;  %559 = vst [vmem:[%s1279_s6 + $0x18] sm:$0xff] %v544_v43  ;;  %v521_v48 = vadd.f32 %v506_v42, %v482_v44 }
 0x115   : > { %v401_v49 = vpop.f32.mrf.mxu0 }
 0x116   : > { %v551_v51 = vadd.f32 %v536_v45, %v521_v48  ;;  %v464_v52 = vadd.f32 %v463_v46, %v401_v49 }
 0x118   : > { %566 = vst [vmem:[%s1279_s6 + $0x50] sm:$0xff] %v551_v51  ;;  %v515_v54 = vadd.f32 %v500_v50, %v464_v52 }
 0x119   : > { %v422_v55 = vpop.f32.mrf.mxu2 }
 0x11a   : > { %v545_v57 = vadd.f32 %v530_v53, %v515_v54  ;;  %v485_v58 = vadd.f32 %v484_v47, %v422_v55 }
 0x11b   : > { %v487_v61 = vpop.f32.mrf.mxu3 }
 0x11c   : > { %v466_v60 = vpop.f32.mrf.mxu1  ;;  %560 = vst [vmem:[%s1279_s6 + $0x20] sm:$0xff] %v545_v57  ;;  %v522_v62 = vadd.f32 %v507_v56, %v485_v58 }
 0x11d   : > { %v404_v63 = vpop.f32.mrf.mxu0 }
 0x11e   : > { %v552_v1 = vadd.f32 %v537_v59, %v522_v62  ;;  %v467_v2 = vadd.f32 %v466_v60, %v404_v63 }
 0x120   : > { %567 = vst [vmem:[%s1279_s6 + $0x58] sm:$0xff] %v552_v1  ;;  %v516_v5 = vadd.f32 %v501_v0, %v467_v2 }
 0x121   : > { %v425_v6 = vpop.f32.mrf.mxu2 }
 0x122   : > { %v546_v8 = vadd.f32 %v531_v3, %v516_v5  ;;  %v488_v9 = vadd.f32 %v487_v61, %v425_v6 }
 0x123   : > { %v490_v15 = vpop.f32.mrf.mxu3 }
 0x124   : > { %v469_v11 = vpop.f32.mrf.mxu1  ;;  %561 = vst [vmem:[%s1279_s6 + $0x28] sm:$0xff] %v546_v8  ;;  %v523_v12 = vadd.f32 %v508_v7, %v488_v9 }
 0x125   : > { %v407_v13 = vpop.f32.mrf.mxu0 }
 0x126   : > { %v553_v16 = vadd.f32 %v538_v10, %v523_v12  ;;  %v470_v17 = vadd.f32 %v469_v11, %v407_v13 }
 0x128   : > { %568 = vst [vmem:[%s1279_s6 + $0x60] sm:$0xff] %v553_v16  ;;  %v517_v19 = vadd.f32 %v502_v14, %v470_v17 }
 0x129   : > { %v428_v20 = vpop.f32.mrf.mxu2 }
 0x12a   : > { %v547_v22 = vadd.f32 %v532_v18, %v517_v19  ;;  %v491_v23 = vadd.f32 %v490_v15, %v428_v20 }
 0x12b   : > { %v493_v32 = vpop.f32.mrf.mxu3 }
 0x12c   : > { %v472_v25 = vpop.f32.mrf.mxu1  ;;  %562 = vst [vmem:[%s1279_s6 + $0x30] sm:$0xff] %v547_v22  ;;  %v524_v27 = vadd.f32 %v509_v21, %v491_v23 }
 0x12d   : > { %v473_v28 = vadd.f32 %v472_v25, %v1276_v4  ;;  %v540_v4 = vld [vmem:[%s1273_s24 + $0x70] sm:$0xff] }
 0x12e   : > { %v554_v30 = vadd.f32 %v539_v24, %v524_v27 }
 0x12f   : > { %v518_v31 = vadd.f32 %v503_v26, %v473_v28 }
 0x130   : > { %569 = vst [vmem:[%s1279_s6 + $0x68] sm:$0xff] %v554_v30 }
 0x131   : > { %v548_v33 = vadd.f32 %v533_v29, %v518_v31  ;;  %v431_v34 = vpop.f32.mrf.mxu2 }
 0x132   : > { %v494_v36 = vadd.f32 %v493_v32, %v431_v34 }
 0x133   : > { %563 = vst [vmem:[%s1279_s6 + $0x38] sm:$0xff] %v548_v33 }
 0x134   : > { %v525_v37 = vadd.f32 %v510_v35, %v494_v36 }
 0x136   : > { %v555_v38 = vadd.f32 %v540_v4, %v525_v37 }
 0x138   : > { %570 = vst [vmem:[%s1279_s6 + $0x70] sm:$0xff] %v555_v38 }
 0x139   : > { %979 = shalt.err (!%p976_p2)
}
 0x13a   : > { %s1033_s13 = smov 128   ;;  %s1034_s9 = smov 256  }
 0x13b   : > { %s1035_s23 = smov 8  }
 0x13c   : > { %768 = dma.vmem_to_hbm [thread:$0]  (%p1170_p7), %s584_s29, 1920, %s586_s30, %s572_s8, %s1033_s13, %s1034_s9, %s1035_s23  }
 0x13d PF: > { %s600_s24 = sand.u32 1, %s1014_s15   ;;  %p1378_p5 = scmp.ge.s32.totalorder %s1026_s18, 2 }
 0x13e   : > { %s601_s6 = scalar_lea.sflag [#allocation4], %s600_s24 }
 0x13f   : > { %p785_p10 = pnand %p1378_p5, %p1174_p9 }
 0x141   : > { %p786_p0 = pneg %p785_p10 }
 0x143   : > { %1009 = dma.done.wait (%p786_p0), %s601_s6, 1920  }
 0x144   : > { %1011 = vsyncadd (%p786_p0), %s601_s6, 4294965376  ;;  %p18_p3 = scmp.ge.s32.totalorder %s1082_s19, 4   ;;  %s1379_s15 = smov %s1018_s16 }
 0x145   : > { %s1380_s16 = smov %s1022_s17  ;;  %s1381_s17 = smov %s1092_s22 }
 0x146   : > { %s1382_s18 = smov %s1082_s19  ;;  %20 = sbr.rel (!%p18_p3) target bundleno = 8 (0x8), region = 107 }
 0x14b   :  { %607 = vsyncpa [#allocation3], 1 }
 0x14c   :  { %609 = vsyncpa [#allocation3 + $0x1], 1 }
 0x14d   :  { %610 = vsyncpa [#allocation6], 1 }
 0x14e   :  { %611 = vsyncpa [#allocation4], 1 }
 0x14f   :  { %613 = vsyncpa [#allocation4 + $0x1], 1 }

</bundles_post_ra>
